<compile_context>
chip_gen: v7x
topology: tpu7x:2x2x1
jax: 0.10.0
libtpu: 0.0.40
codegen_flags: <defaults>
</compile_context>

<pallas_src>
import functools

import jax
import jax.numpy as jnp
from jax import lax
from jax.experimental import pallas as pl
from jax.experimental.pallas import tpu as pltpu


# ---------------------------------------------------------------------------
# Kernel
# ---------------------------------------------------------------------------

def _channel_attention_kernel(x_ref, w1_ref, w2_ref, o_ref, sum_ref, max_ref,
                              *, hw, ts, need_mask):
    """Fused global avg/max pool + shared MLP + sigmoid.

    Grid = (batch_blocks, spatial_blocks); spatial is the reduction axis.
      x_ref  : (TB, C, TS)   input block of (N, C, H*W), native dtype
      w1_ref : (C, CH)       f32 first 1x1-conv weight  (as a matmul)
      w2_ref : (CH, C)       f32 second 1x1-conv weight (as a matmul)
      o_ref  : (TB, C)       attention output
      sum_ref/max_ref : (TB, C) f32 VMEM accumulators
    """
    s = pl.program_id(1)
    last = pl.num_programs(1) - 1

    @pl.when(s == 0)
    def _():
        sum_ref[...] = jnp.zeros_like(sum_ref)
        max_ref[...] = jnp.full_like(max_ref, -jnp.inf)

    x = x_ref[...].astype(jnp.float32)                     # (TB, C, TS)

    if need_mask:
        # Steady-state blocks: no per-element selects.
        @pl.when(s != last)
        def _():
            sum_ref[...] += jnp.sum(x, axis=-1)
            max_ref[...] = jnp.maximum(max_ref[...], jnp.max(x, axis=-1))

        # Ragged tail: mask out-of-range spatial positions.
        @pl.when(s == last)
        def _():
            pos = s * ts + lax.broadcasted_iota(jnp.int32, x.shape, 2)
            valid = pos < hw
            sum_ref[...] += jnp.sum(jnp.where(valid, x, 0.0), axis=-1)
            max_ref[...] = jnp.maximum(
                max_ref[...], jnp.max(jnp.where(valid, x, -jnp.inf), axis=-1))
    else:
        sum_ref[...] += jnp.sum(x, axis=-1)
        max_ref[...] = jnp.maximum(max_ref[...], jnp.max(x, axis=-1))

    @pl.when(s == last)
    def _():
        def shared_mlp(v):                                 # (TB, C) -> (TB, C)
            h = jnp.maximum(
                jnp.dot(v, w1_ref[...], preferred_element_type=jnp.float32),
                0.0)
            return jnp.dot(h, w2_ref[...],
                           preferred_element_type=jnp.float32)

        avg = sum_ref[...] * (1.0 / hw)
        z = shared_mlp(avg) + shared_mlp(max_ref[...])
        o_ref[...] = (1.0 / (1.0 + jnp.exp(-z))).astype(o_ref.dtype)


# ---------------------------------------------------------------------------
# Wrapper
# ---------------------------------------------------------------------------

def channel_attention(x, w1, w2, *, batch_tile=8, vmem_budget_bytes=4 << 20):
    """x: (N, C, H, W) (NCHW, as in PyTorch), any float dtype.

    w1: (C//ratio, C, 1, 1)  -- Conv2d(C, C//ratio, 1, bias=False).weight
    w2: (C, C//ratio, 1, 1)  -- Conv2d(C//ratio, C, 1, bias=False).weight
    Returns the channel-attention map of shape (N, C, 1, 1), dtype of x.
    """
    N, C, H, W = x.shape
    ch = w1.shape[0]
    hw = H * W

    # Free, contiguous reshape -- no transpose / im2col copies in HBM, and
    # the input keeps its native dtype (bf16 input => half the HBM traffic).
    x3 = x.reshape(N, C, hw)
    w1m = w1.reshape(ch, C).astype(jnp.float32).T          # (C, ch)
    w2m = w2.reshape(C, ch).astype(jnp.float32).T          # (ch, C)

    tb = min(N, batch_tile)
    bytes_per_elem = jnp.dtype(x.dtype).itemsize

    # Spatial tile sized to a VMEM budget (bounded VMEM regardless of H*W;
    # double-buffered block stays well under the default scoped VMEM limit).
    if tb * C * hw * bytes_per_elem <= vmem_budget_bytes:
        ts = hw                                            # single reduction step
    else:
        ts = (vmem_budget_bytes // (tb * C * bytes_per_elem)) // 128 * 128
        ts = min(max(ts, 128), hw)
    need_mask = (hw % ts) != 0

    grid = (pl.cdiv(N, tb), pl.cdiv(hw, ts))

    out = pl.pallas_call(
        functools.partial(_channel_attention_kernel,
                          hw=hw, ts=ts, need_mask=need_mask),
        out_shape=jax.ShapeDtypeStruct((N, C), x.dtype),
        grid_spec=pltpu.PrefetchScalarGridSpec(
            num_scalar_prefetch=0,
            grid=grid,
            in_specs=[
                pl.BlockSpec((tb, C, ts), lambda b, s: (b, 0, s)),
                pl.BlockSpec((C, ch), lambda b, s: (0, 0)),
                pl.BlockSpec((ch, C), lambda b, s: (0, 0)),
            ],
            out_specs=pl.BlockSpec((tb, C), lambda b, s: (b, 0)),
            scratch_shapes=[pltpu.VMEM((tb, C), jnp.float32),
                            pltpu.VMEM((tb, C), jnp.float32)],
        ),
        compiler_params=pltpu.CompilerParams(
            dimension_semantics=("parallel", "arbitrary")),
    )(x3, w1m, w2m)

    return out.reshape(N, C, 1, 1)


# ---------------------------------------------------------------------------
# Reference + self-test
# ---------------------------------------------------------------------------

def _reference(x, w1, w2):
    """Pure-JAX reference of the PyTorch forward (eval semantics)."""
    N, C, H, W = x.shape
    ch = w1.shape[0]
    xf = x.astype(jnp.float32)
    avg = jnp.mean(xf, axis=(2, 3))                        # AdaptiveAvgPool2d(1)
    mx = jnp.max(xf, axis=(2, 3))                          # AdaptiveMaxPool2d(1)
    w1m = w1.reshape(ch, C).astype(jnp.float32).T
    w2m = w2.reshape(C, ch).astype(jnp.float32).T

    def mlp(v):
        return jnp.maximum(v @ w1m, 0.0) @ w2m

    return jax.nn.sigmoid(mlp(avg) + mlp(mx)).reshape(N, C, 1, 1)


if __name__ == "__main__":
    key = jax.random.PRNGKey(0)
    k_x, k_w1, k_w2, k_x2 = jax.random.split(key, 4)

    # --- Case 1: nominal shapes (ratio=16 needs channel >= 16) -------------
    N, C, H, W = 2, 64, 16, 16
    ratio = 16
    ch = C // ratio

    x = jax.random.normal(k_x, (N, C, H, W), jnp.float32)
    w1 = jax.random.normal(k_w1, (ch, C, 1, 1), jnp.float32) / jnp.sqrt(C)
    w2 = jax.random.normal(k_w2, (C, ch, 1, 1), jnp.float32) / jnp.sqrt(ch)

    out = jax.block_until_ready(channel_attention(x, w1, w2))
    ref = _reference(x, w1, w2)

    assert out.shape == (N, C, 1, 1), out.shape
    assert bool(jnp.all(jnp.isfinite(out)))
    assert bool(jnp.allclose(out, ref, atol=1e-5, rtol=1e-5)), \
        float(jnp.max(jnp.abs(out - ref)))

    # --- Case 2: force multi-step spatial reduction + ragged tail mask -----
    N2, C2, H2, W2 = 2, 32, 23, 11                         # hw = 253 (ragged)
    ch2 = C2 // ratio
    x2 = jax.random.normal(k_x2, (N2, C2, H2, W2), jnp.float32)
    w1b = jax.random.normal(k_w1, (ch2, C2, 1, 1), jnp.float32) / jnp.sqrt(C2)
    w2b = jax.random.normal(k_w2, (C2, ch2, 1, 1), jnp.float32) / jnp.sqrt(ch2)

    out2 = jax.block_until_ready(
        channel_attention(x2, w1b, w2b, vmem_budget_bytes=32 * 1024))
    ref2 = _reference(x2, w1b, w2b)

    assert out2.shape == (N2, C2, 1, 1), out2.shape
    assert bool(jnp.all(jnp.isfinite(out2)))
    assert bool(jnp.allclose(out2, ref2, atol=1e-5, rtol=1e-5)), \
        float(jnp.max(jnp.abs(out2 - ref2)))

    print("KERNEL_OK")
</pallas_src>

<mosaic_0001>
module attributes {stable_mosaic.version = 11 : i64} {
  func.func @_channel_attention_kernel(%arg0: i32, %arg1: i32, %arg2: memref<2x64x256xf32, #tpu.memory_space<vmem>>, %arg3: memref<64x4xf32, #tpu.memory_space<vmem>>, %arg4: memref<4x64xf32, #tpu.memory_space<vmem>>, %arg5: memref<2x64xf32, #tpu.memory_space<vmem>>, %arg6: memref<2x64xf32, #tpu.memory_space<vmem>>, %arg7: memref<2x64xf32, #tpu.memory_space<vmem>>) attributes {dimension_semantics = [#tpu.dimension_semantics<parallel>, #tpu.dimension_semantics<arbitrary>], iteration_bounds = array<i64: 1, 1>, scalar_prefetch = 0 : i64, scratch_operands = 2 : i64, tpu.core_type = #tpu.core_type<tc>, window_params = [{transform_indices = @transform_0, window_bounds = array<i64: 2, 64, 256>}, {pipeline_mode = #tpu.pipeline_mode<synchronous>, transform_indices = @transform_1, window_bounds = array<i64: 64, 4>}, {pipeline_mode = #tpu.pipeline_mode<synchronous>, transform_indices = @transform_2, window_bounds = array<i64: 4, 64>}, {transform_indices = @transform_3, window_bounds = array<i64: 2, 64>}]} {
    %c0_i32 = arith.constant 0 : i32
    %0 = arith.cmpi eq, %arg1, %c0_i32 : i32
    %1 = arith.extui %0 : i1 to i32
    %c0_i32_0 = arith.constant 0 : i32
    %2 = arith.cmpi ne, %1, %c0_i32_0 : i32
    scf.if %2 {
      %cst_14 = arith.constant 0.000000e+00 : f32
      %15 = vector.broadcast %cst_14 : f32 to vector<2x64xf32>
      %c0_15 = arith.constant 0 : index
      %c0_16 = arith.constant 0 : index
      %16 = vector.load %arg6[%c0_15, %c0_16] : memref<2x64xf32, #tpu.memory_space<vmem>>, vector<2x64xf32>
      tpu.vector_store %arg6[%c0_15, %c0_16], %15 {strides = array<i32>} : memref<2x64xf32, #tpu.memory_space<vmem>>, vector<2x64xf32>,
      %cst_17 = arith.constant 0xFF800000 : f32
      %17 = vector.broadcast %cst_17 : f32 to vector<2x64xf32>
      %c0_18 = arith.constant 0 : index
      %c0_19 = arith.constant 0 : index
      %18 = vector.load %arg7[%c0_18, %c0_19] : memref<2x64xf32, #tpu.memory_space<vmem>>, vector<2x64xf32>
      tpu.vector_store %arg7[%c0_18, %c0_19], %17 {strides = array<i32>} : memref<2x64xf32, #tpu.memory_space<vmem>>, vector<2x64xf32>,
    } else {
    }
    %c0 = arith.constant 0 : index
    %c0_1 = arith.constant 0 : index
    %c0_2 = arith.constant 0 : index
    %3 = vector.load %arg2[%c0, %c0_1, %c0_2] : memref<2x64x256xf32, #tpu.memory_space<vmem>>, vector<2x64x256xf32>
    %c0_3 = arith.constant 0 : index
    %c0_4 = arith.constant 0 : index
    %4 = vector.load %arg6[%c0_3, %c0_4] : memref<2x64xf32, #tpu.memory_space<vmem>>, vector<2x64xf32>
    %cst = arith.constant dense<0.000000e+00> : vector<2x64xf32>
    %5 = vector.multi_reduction <add>, %3, %cst [2] : vector<2x64x256xf32> to vector<2x64xf32>
    %6 = arith.addf %4, %5 : vector<2x64xf32>
    %c0_5 = arith.constant 0 : index
    %c0_6 = arith.constant 0 : index
    %7 = vector.load %arg6[%c0_5, %c0_6] : memref<2x64xf32, #tpu.memory_space<vmem>>, vector<2x64xf32>
    tpu.vector_store %arg6[%c0_5, %c0_6], %6 {strides = array<i32>} : memref<2x64xf32, #tpu.memory_space<vmem>>, vector<2x64xf32>,
    %c0_7 = arith.constant 0 : index
    %c0_8 = arith.constant 0 : index
    %8 = vector.load %arg7[%c0_7, %c0_8] : memref<2x64xf32, #tpu.memory_space<vmem>>, vector<2x64xf32>
    %cst_9 = arith.constant dense<0xFF800000> : vector<2x64xf32>
    %9 = vector.multi_reduction <maximumf>, %3, %cst_9 [2] : vector<2x64x256xf32> to vector<2x64xf32>
    %10 = arith.maximumf %8, %9 : vector<2x64xf32>
    %c0_10 = arith.constant 0 : index
    %c0_11 = arith.constant 0 : index
    %11 = vector.load %arg7[%c0_10, %c0_11] : memref<2x64xf32, #tpu.memory_space<vmem>>, vector<2x64xf32>
    tpu.vector_store %arg7[%c0_10, %c0_11], %10 {strides = array<i32>} : memref<2x64xf32, #tpu.memory_space<vmem>>, vector<2x64xf32>,
    %c0_i32_12 = arith.constant 0 : i32
    %12 = arith.cmpi eq, %arg1, %c0_i32_12 : i32
    %13 = arith.extui %12 : i1 to i32
    %c0_i32_13 = arith.constant 0 : i32
    %14 = arith.cmpi ne, %13, %c0_i32_13 : i32
    scf.if %14 {
      %c0_14 = arith.constant 0 : index
      %c0_15 = arith.constant 0 : index
      %15 = vector.load %arg6[%c0_14, %c0_15] : memref<2x64xf32, #tpu.memory_space<vmem>>, vector<2x64xf32>
      %cst_16 = arith.constant 3.906250e-03 : f32
      %16 = vector.broadcast %cst_16 : f32 to vector<2x64xf32>
      %17 = arith.mulf %15, %16 : vector<2x64xf32>
      %c0_17 = arith.constant 0 : index
      %c0_18 = arith.constant 0 : index
      %18 = vector.load %arg3[%c0_17, %c0_18] : memref<64x4xf32, #tpu.memory_space<vmem>>, vector<64x4xf32>
      %cst_19 = arith.constant dense<0.000000e+00> : vector<2x4xf32>
      %19 = tpu.matmul %17, %18, %cst_19 {dimension_numbers = #tpu.dot_dimension_numbers<[1], [0], [0], [1], [0, 0, 1, 1], [], []>} : vector<2x64xf32>, vector<64x4xf32>, vector<2x4xf32> -> vector<2x4xf32>
      %cst_20 = arith.constant 0.000000e+00 : f32
      %20 = vector.broadcast %cst_20 : f32 to vector<2x4xf32>
      %21 = arith.maximumf %19, %20 : vector<2x4xf32>
      %c0_21 = arith.constant 0 : index
      %c0_22 = arith.constant 0 : index
      %22 = vector.load %arg4[%c0_21, %c0_22] : memref<4x64xf32, #tpu.memory_space<vmem>>, vector<4x64xf32>
      %cst_23 = arith.constant dense<0.000000e+00> : vector<2x64xf32>
      %23 = tpu.matmul %21, %22, %cst_23 {dimension_numbers = #tpu.dot_dimension_numbers<[1], [0], [0], [1], [0, 0, 1, 1], [], []>} : vector<2x4xf32>, vector<4x64xf32>, vector<2x64xf32> -> vector<2x64xf32>
      %c0_24 = arith.constant 0 : index
      %c0_25 = arith.constant 0 : index
      %24 = vector.load %arg7[%c0_24, %c0_25] : memref<2x64xf32, #tpu.memory_space<vmem>>, vector<2x64xf32>
      %c0_26 = arith.constant 0 : index
      %c0_27 = arith.constant 0 : index
      %25 = vector.load %arg3[%c0_26, %c0_27] : memref<64x4xf32, #tpu.memory_space<vmem>>, vector<64x4xf32>
      %cst_28 = arith.constant dense<0.000000e+00> : vector<2x4xf32>
      %26 = tpu.matmul %24, %25, %cst_28 {dimension_numbers = #tpu.dot_dimension_numbers<[1], [0], [0], [1], [0, 0, 1, 1], [], []>} : vector<2x64xf32>, vector<64x4xf32>, vector<2x4xf32> -> vector<2x4xf32>
      %cst_29 = arith.constant 0.000000e+00 : f32
      %27 = vector.broadcast %cst_29 : f32 to vector<2x4xf32>
      %28 = arith.maximumf %26, %27 : vector<2x4xf32>
      %c0_30 = arith.constant 0 : index
      %c0_31 = arith.constant 0 : index
      %29 = vector.load %arg4[%c0_30, %c0_31] : memref<4x64xf32, #tpu.memory_space<vmem>>, vector<4x64xf32>
      %cst_32 = arith.constant dense<0.000000e+00> : vector<2x64xf32>
      %30 = tpu.matmul %28, %29, %cst_32 {dimension_numbers = #tpu.dot_dimension_numbers<[1], [0], [0], [1], [0, 0, 1, 1], [], []>} : vector<2x4xf32>, vector<4x64xf32>, vector<2x64xf32> -> vector<2x64xf32>
      %31 = arith.addf %23, %30 : vector<2x64xf32>
      %cst_33 = arith.constant 0.000000e+00 : f32
      %32 = vector.broadcast %cst_33 : f32 to vector<2x64xf32>
      %33 = arith.subf %32, %31 : vector<2x64xf32>
      %34 = math.exp %33 : vector<2x64xf32>
      %cst_34 = arith.constant 1.000000e+00 : f32
      %35 = vector.broadcast %cst_34 : f32 to vector<2x64xf32>
      %36 = arith.addf %35, %34 : vector<2x64xf32>
      %cst_35 = arith.constant 1.000000e+00 : f32
      %37 = vector.broadcast %cst_35 : f32 to vector<2x64xf32>
      %38 = arith.divf %37, %36 : vector<2x64xf32>
      %c0_36 = arith.constant 0 : index
      %c0_37 = arith.constant 0 : index
      %39 = vector.load %arg5[%c0_36, %c0_37] : memref<2x64xf32, #tpu.memory_space<vmem>>, vector<2x64xf32>
      tpu.vector_store %arg5[%c0_36, %c0_37], %38 {strides = array<i32>} : memref<2x64xf32, #tpu.memory_space<vmem>>, vector<2x64xf32>,
    } else {
    }
    return
  }
  func.func @transform_0(%arg0: i32, %arg1: i32) -> (i32, i32, i32) {
    %c0_i32 = arith.constant 0 : i32
    %c0_i32_0 = arith.constant 0 : i32
    return %arg0, %c0_i32, %arg1 : i32, i32, i32
  }
  func.func @transform_1(%arg0: i32, %arg1: i32) -> (i32, i32) {
    %c0_i32 = arith.constant 0 : i32
    %c0_i32_0 = arith.constant 0 : i32
    %c0_i32_1 = arith.constant 0 : i32
    return %c0_i32, %c0_i32_0 : i32, i32
  }
  func.func @transform_2(%arg0: i32, %arg1: i32) -> (i32, i32) {
    %c0_i32 = arith.constant 0 : i32
    %c0_i32_0 = arith.constant 0 : i32
    %c0_i32_1 = arith.constant 0 : i32
    return %c0_i32, %c0_i32_0 : i32, i32
  }
  func.func @transform_3(%arg0: i32, %arg1: i32) -> (i32, i32) {
    %c0_i32 = arith.constant 0 : i32
    %c0_i32_0 = arith.constant 0 : i32
    return %arg0, %c0_i32 : i32, i32
  }
}

</mosaic_0001>

<bundles_post_ra>
// kernel: tpu_custom_call.1
= control target key start
LH: loop header
LB: loop body
LE: loop exit
PB: predicated region body
PF: predicated region fallthrough
CT: control target
= control target key end

     0   :  { %8 = vsyncpa [#allocation5], 0  ;;  %s1075_s0 = inlined_call_operand.hbm [shape: f32[2,64,256], index: 0, kind: input, shape index: {}]   ;;  %s1076_s1 = inlined_call_operand.vmem [shape: f32[64,4], index: 1, kind: input, shape index: {}]   ;;  %s1077_s2 = inlined_call_operand.vmem [shape: f32[4,64], index: 2, kind: input, shape index: {}]   ;;  %s1078_s3 = inlined_call_operand.hbm [shape: f32[2,64], index: 3, kind: output, shape index: {}]  }
   0x1   :  { %9 = vsyncpa [#allocation6], 0  ;;  %s878_s12 = smov [#allocation4]   ;;  %s830_s16 = scalar_lea.hbm %s1075_s0, 4096 }
   0x2   :  { %s15_s13 = sshll.u32 %s878_s12, 4  ;;  %p831_p0 = scmp.ne.s32.totalorder %s1075_s0, %s830_s16  ;;  %s16_s13 = int_to_ptr.vmem [resolvable:$true] %s15_s13 }
   0x3   :  { %p834_p1 = scmp.lt.u32.totalorder %s830_s16, %s1075_s0 }
   0x5   :  { %p836_p2 = pnand %p834_p1, %p831_p0 }
   0x7   :  { %839 = shalt.err (!%p836_p2)
}
   0x8   :  { %s840_s21 = scalar_lea.vmem %s16_s13, 4096  ;;  %p845_p4 = scmp.lt.s32.totalorder %s16_s13, %s16_s13 }
   0x9   :  { %p841_p3 = scmp.ne.s32.totalorder %s16_s13, %s840_s21  ;;  %p846_p5 = scmp.lt.s32.totalorder %s840_s21, %s840_s21 }
   0xb   :  { %p847_p6 = por %p846_p5, %p845_p4 }
   0xd   :  { %p848_p7 = pnand %p847_p6, %p841_p3 }
   0xf   :  { %851 = shalt.err (!%p848_p7)
}
  0x10   :  { %s879_s22 = smov 256   ;;  %s880_s23 = smov 16  }
  0x11   :  { %21 = dma.hbm_to_vmem [thread:$0]  %s1075_s0, 4096, %s16_s13, [#allocation5], %s879_s22, %s879_s22, %s880_s23  }
  0x12   :  { %874 = dma.done.wait [#allocation5], 4096  }
  0x13   :  { %875 = vsyncadd [#allocation5], 4294963200  ;;  %v52_v0 = vld [vmem:[#allocation4 + $0x80] sm:$0xff]  ;;  %v53_v1 = vld [vmem:[#allocation4 + $0x88] sm:$0xff]  ;;  %vm33_vm0 = vcmask 517120   ;;  %vm884_vm1 = vmmov 0  }
  0x14   :  { %v36_v2 = vld [vmem:[#allocation4] sm:$0xff]  ;;  %v93_v3 = vadd.f32 %v53_v1, %v52_v0  ;;  %v37_v4 = vld [vmem:[#allocation4 + $0x8] sm:$0xff]  ;;  %v54_v5 = vld [vmem:[#allocation4 + $0x90] sm:$0xff]  ;;  %v258_v27 = vmax.f32 %v52_v0, %v53_v1  ;;  %v881_v0 = vmov 0.0   ;;  %vm144_vm2 = vcmask 130112  }
  0x15   :  { %v55_v6 = vld [vmem:[#allocation4 + $0x98] sm:$0xff]  ;;  %v69_v7 = vadd.f32 %v37_v4, %v36_v2  ;;  %v38_v8 = vld [vmem:[#allocation4 + $0x10] sm:$0xff]  ;;  %v56_v12 = vld [vmem:[#allocation4 + $0xa0] sm:$0xff]  ;;  %v234_v25 = vmax.f32 %v36_v2, %v37_v4  ;;  %34 = vst.msk [vmem:[#allocation2] sm:$0x3] %vm33_vm0, %v881_v0  ;;  %v882_v4 = vmov 0.0|0.0   ;;  %761 = vmatprep.mubr.msk.f32.mxu0 %vm884_vm1, %v881_v0  ;;  %780 = vmatprep.mubr.msk.f32.mxu1 %vm884_vm1, %v881_v0 }
  0x16   :  { %v39_v9 = vld [vmem:[#allocation4 + $0x18] sm:$0xff]  ;;  %94 = vadd.xlane.f32.xlu1 %v93_v3  ;;  %v96_v10 = vadd.f32 %v55_v6, %v54_v5  ;;  %v57_v13 = vld [vmem:[#allocation4 + $0xa8] sm:$0xff]  ;;  %v40_v14 = vld [vmem:[#allocation4 + $0x20] sm:$0xff]  ;;  %v261_v26 = vmax.f32 %v54_v5, %v55_v6  ;;  %793 = vmatprep.subr.bf16.mxu0 %v882_v4  ;;  %vm151_vm3 = vcmask 195712   ;;  %vm158_vm4 = vcmask 261312  }
  0x17   :  { %70 = vadd.xlane.f32.xlu0 %v69_v7  ;;  %v72_v11 = vadd.f32 %v39_v9, %v38_v8  ;;  %v41_v15 = vld [vmem:[#allocation4 + $0x28] sm:$0xff]  ;;  %v99_v16 = vadd.f32 %v57_v13, %v56_v12  ;;  %v58_v18 = vld [vmem:[#allocation4 + $0xb0] sm:$0xff]  ;;  %v59_v19 = vld [vmem:[#allocation4 + $0xb8] sm:$0xff]  ;;  %v237_v24 = vmax.f32 %v38_v8, %v39_v9  ;;  %v264_v34 = vmax.f32 %v56_v12, %v57_v13 }
  0x18   :  { %v75_v17 = vadd.f32 %v41_v15, %v40_v14  ;;  %v42_v20 = vld [vmem:[#allocation4 + $0x30] sm:$0xff]  ;;  %v43_v21 = vld [vmem:[#allocation4 + $0x38] sm:$0xff]  ;;  %v102_v22 = vadd.f32 %v59_v19, %v58_v18  ;;  %v60_v28 = vld [vmem:[#allocation4 + $0xc0] sm:$0xff]  ;;  %v240_v35 = vmax.f32 %v40_v14, %v41_v15  ;;  %v267_v42 = vmax.f32 %v58_v18, %v59_v19  ;;  %805 = vmatprep.subr.bf16.mxu1 %v882_v4 }
  0x19   :  { %v78_v23 = vadd.f32 %v43_v21, %v42_v20  ;;  %v61_v29 = vld [vmem:[#allocation4 + $0xc8] sm:$0xff]  ;;  %v44_v30 = vld [vmem:[#allocation4 + $0x40] sm:$0xff]  ;;  %v62_v36 = vld [vmem:[#allocation4 + $0xd0] sm:$0xff]  ;;  %v243_v43 = vmax.f32 %v42_v20, %v43_v21  ;;  %vm165_vm5 = vcmask 326912   ;;  %vm172_vm6 = vcmask 392512  }
  0x1a   :  { %97 = vadd.xlane.f32.xlu1 %v96_v10  ;;  %v45_v31 = vld [vmem:[#allocation4 + $0x48] sm:$0xff]  ;;  %v105_v32 = vadd.f32 %v61_v29, %v60_v28  ;;  %v63_v37 = vld [vmem:[#allocation4 + $0xd8] sm:$0xff]  ;;  %v46_v38 = vld [vmem:[#allocation4 + $0x50] sm:$0xff]  ;;  %v270_v50 = vmax.f32 %v60_v28, %v61_v29  ;;  %v133_v29 = vlaneseq  ;;  %vm179_vm7 = vcmask 458112  }
  0x1b   :  { %73 = vadd.xlane.f32.xlu0 %v72_v11  ;;  %v81_v33 = vadd.f32 %v45_v31, %v44_v30  ;;  %v47_v39 = vld [vmem:[#allocation4 + $0x58] sm:$0xff]  ;;  %v108_v40 = vadd.f32 %v63_v37, %v62_v36  ;;  %v64_v44 = vld [vmem:[#allocation4 + $0xe0] sm:$0xff]  ;;  %v65_v45 = vld [vmem:[#allocation4 + $0xe8] sm:$0xff]  ;;  %v246_v51 = vmax.f32 %v44_v30, %v45_v31  ;;  %v273_v58 = vmax.f32 %v62_v36, %v63_v37 }
  0x1c   :  { %v84_v41 = vadd.f32 %v47_v39, %v46_v38  ;;  %v48_v46 = vld [vmem:[#allocation4 + $0x60] sm:$0xff]  ;;  %v49_v47 = vld [vmem:[#allocation4 + $0x68] sm:$0xff]  ;;  %v111_v48 = vadd.f32 %v65_v45, %v64_v44  ;;  %v66_v52 = vld [vmem:[#allocation4 + $0xf0] sm:$0xff]  ;;  %v249_v59 = vmax.f32 %v46_v38, %v47_v39  ;;  %v276_v60 = vmax.f32 %v64_v44, %v65_v45 }
  0x1d   :  { %v87_v49 = vadd.f32 %v49_v47, %v48_v46  ;;  %v67_v53 = vld [vmem:[#allocation4 + $0xf8] sm:$0xff]  ;;  %v50_v54 = vld [vmem:[#allocation4 + $0x70] sm:$0xff]  ;;  %v252_v61 = vmax.f32 %v48_v46, %v49_v47  ;;  %v386_v2 = vld [vmem:[%s1076_s1 + $0x8] sm:$0xff]  ;;  %v883_v11 = vmov -inf   ;;  %v136_v37 = vshrl.u32 %v133_v29, 7 }
  0x1e   :  { %100 = vadd.xlane.f32.xlu1 %v99_v16  ;;  %v51_v55 = vld [vmem:[#allocation4 + $0x78] sm:$0xff]  ;;  %v114_v56 = vadd.f32 %v67_v53, %v66_v52  ;;  %v279_v62 = vmax.f32 %v66_v52, %v67_v53  ;;  %v387_v5 = vld [vmem:[%s1076_s1 + $0x10] sm:$0xff]  ;;  %v390_v9 = vld [vmem:[%s1076_s1 + $0x28] sm:$0xff]  ;;  %35 = vst.msk [vmem:[#allocation3] sm:$0x3] %vm33_vm0, %v883_v11  ;;  %vm186_vm8 = vcmask 523712  }
  0x1f   :  { %76 = vadd.xlane.f32.xlu0 %v75_v17  ;;  %v90_v57 = vadd.f32 %v51_v55, %v50_v54  ;;  %v255_v63 = vmax.f32 %v50_v54, %v51_v55  ;;  %v385_v1 = vld [vmem:[%s1076_s1] sm:$0xff]  ;;  %v388_v6 = vld [vmem:[%s1076_s1 + $0x18] sm:$0xff]  ;;  %v391_v12 = vld [vmem:[%s1076_s1 + $0x30] sm:$0xff]  ;;  %vm227_vm9 = vcmask 1041409   ;;  %vm393_vm10 = vcmask 523264  }
  0x20   :  { %v794_v3 = vpack.c.bf16 %v386_v2, %v385_v1  ;;  %v797_v7 = vpack.c.bf16 %v388_v6, %v387_v5  ;;  %v389_v8 = vld [vmem:[%s1076_s1 + $0x20] sm:$0xff]  ;;  %v392_v13 = vld [vmem:[%s1076_s1 + $0x38] sm:$0xff]  ;;  %vm548_vm11 = vcmask 1043456   ;;  %vm544_vm12 = vcmask 31744  }
  0x21   :  { %v800_v10 = vpack.c.bf16 %v390_v9, %v389_v8  ;;  %v803_v14 = vpack.c.bf16 %v392_v13, %v391_v12 }
  0x22   :  { %103 = vadd.xlane.f32.xlu1 %v102_v22  ;;  %795 = vmatpush3.bf16.msra.mxu0 %v794_v3 }
  0x23   :  { %79 = vadd.xlane.f32.xlu0 %v78_v23  ;;  %807 = vmatpush3.bf16.msra.mxu1 %v794_v3 }
  0x24   :  { %796 = vmatprep.subr.bf16.mxu0 %v882_v4  ;;  %808 = vmatprep.subr.bf16.mxu1 %v882_v4 }
  0x26   :  { %238 = vmax.xlane.f32.xlu1 %v237_v24  ;;  %798 = vmatpush3.bf16.msra.mxu0 %v797_v7 }
  0x27   :  { %235 = vmax.xlane.f32.xlu0 %v234_v25  ;;  %810 = vmatpush3.bf16.msra.mxu1 %v797_v7 }
  0x28   :  { %799 = vmatprep.subr.bf16.mxu0 %v882_v4  ;;  %811 = vmatprep.subr.bf16.mxu1 %v882_v4 }
  0x2a   :  { %262 = vmax.xlane.f32.xlu1 %v261_v26  ;;  %801 = vmatpush3.bf16.msra.mxu0 %v800_v10 }
  0x2b   :  { %259 = vmax.xlane.f32.xlu0 %v258_v27  ;;  %813 = vmatpush3.bf16.msra.mxu1 %v800_v10 }
  0x2c   :  { %802 = vmatprep.subr.bf16.mxu0 %v882_v4  ;;  %814 = vmatprep.subr.bf16.mxu1 %v882_v4 }
  0x2e   :  { %106 = vadd.xlane.f32.xlu1 %v105_v32  ;;  %804 = vmatpush3.bf16.msra.mxu0 %v803_v14  ;;  %v134_v32 = vand.u32 127, %v133_v29  ;;  %v68_v29 = vld [vmem:[#allocation2] sm:$0x3] }
  0x2f   :  { %82 = vadd.xlane.f32.xlu0 %v81_v33  ;;  %816 = vmatpush3.bf16.msra.mxu1 %v803_v14 }
  0x30   :  { %788 = vmatprep.subr.mxu0 %v881_v0  ;;  %783 = vmatprep.subr.mxu1 %v881_v0  ;;  %v146_v36 = vadd.s32 4294967280, %v134_v32  ;;  %v153_v38 = vadd.s32 4294967272, %v134_v32  ;;  %v160_v39 = vadd.s32 4294967264, %v134_v32  ;;  %v174_v45 = vadd.s32 4294967248, %v134_v32 }
  0x31   :  { %v971_v46 = vsub.s32 %v134_v32, %v136_v37  ;;  %v181_v53 = vadd.s32 4294967240, %v134_v32 }
  0x32   :  { %265 = vmax.xlane.f32.xlu1 %v264_v34  ;;  %v139_v34 = vadd.s32 4294967288, %v134_v32  ;;  %v969_v44 = vsub.s32 %v146_v36, %v136_v37  ;;  %v973_v47 = vsub.s32 %v153_v38, %v136_v37 }
  0x33   :  { %241 = vmax.xlane.f32.xlu0 %v240_v35  ;;  %v993_v5 = vsub.s32 %v181_v53, %v136_v37 }
  0x36   :  { %109 = vadd.xlane.f32.xlu1 %v108_v40 }
  0x37   :  { %85 = vadd.xlane.f32.xlu0 %v84_v41  ;;  %v965_v41 = vsub.s32 %v139_v34, %v136_v37 }
  0x3a   :  { %268 = vmax.xlane.f32.xlu1 %v267_v42  ;;  %v167_v42 = vadd.s32 4294967256, %v134_v32 }
  0x3b   :  { %244 = vmax.xlane.f32.xlu0 %v243_v43 }
  0x3e   :  { %112 = vadd.xlane.f32.xlu1 %v111_v48  ;;  %v975_v48 = vsub.s32 %v160_v39, %v136_v37 }
  0x3f   :  { %88 = vadd.xlane.f32.xlu0 %v87_v49 }
  0x42   :  { %271 = vmax.xlane.f32.xlu1 %v270_v50 }
  0x43   :  { %247 = vmax.xlane.f32.xlu0 %v246_v51  ;;  %v978_v51 = vsub.s32 %v167_v42, %v136_v37 }
  0x46   :  { %115 = vadd.xlane.f32.xlu1 %v114_v56  ;;  %v982_v56 = vsub.s32 %v174_v45, %v136_v37 }
  0x47   :  { %91 = vadd.xlane.f32.xlu0 %v90_v57 }
  0x4a   :  { %274 = vmax.xlane.f32.xlu1 %v273_v58 }
  0x4b   :  { %250 = vmax.xlane.f32.xlu0 %v249_v59 }
  0x4e   :  { %277 = vmax.xlane.f32.xlu1 %v276_v60 }
  0x4f   :  { %253 = vmax.xlane.f32.xlu0 %v252_v61 }
  0x52   :  { %280 = vmax.xlane.f32.xlu1 %v279_v62 }
  0x53   :  { %256 = vmax.xlane.f32.xlu0 %v255_v63 }
  0xa3   :  { %v95_v15 = vpop.xlane.xlu1 %94 }
  0xa4   :  { %v71_v16 = vpop.xlane.xlu0 %70  ;;  %v191_v57 = vrot.slane %v95_v15, %v971_v46 }
  0xa5   :  { %v138_v60 = vrot.slane %v71_v16, %v971_v46 }
  0xa7   :  { %v98_v17 = vpop.xlane.xlu1 %97 }
  0xa8   :  { %v74_v18 = vpop.xlane.xlu0 %73  ;;  %v195_v50 = vrot.slane %v98_v17, %v965_v41 }
  0xa9   :  { %v143_v54 = vrot.slane %v74_v18, %v965_v41 }
  0xaa   :  { %v196_v1 = vsel %vm144_vm2, %v195_v50, %v191_v57 }
  0xab   :  { %v101_v19 = vpop.xlane.xlu1 %100  ;;  %v145_v6 = vsel %vm144_vm2, %v143_v54, %v138_v60 }
  0xac   :  { %v77_v20 = vpop.xlane.xlu0 %76  ;;  %v200_v55 = vrot.slane %v101_v19, %v969_v44 }
  0xad   :  { %v150_v58 = vrot.slane %v77_v20, %v969_v44 }
  0xae   :  { %v201_v7 = vsel %vm151_vm3, %v200_v55, %v196_v1  ;;  %v233_v1 = vld [vmem:[#allocation3] sm:$0x3] }
  0xaf   :  { %v104_v21 = vpop.xlane.xlu1 %103  ;;  %v152_v10 = vsel %vm151_vm3, %v150_v58, %v145_v6 }
  0xb0   :  { %v80_v22 = vpop.xlane.xlu0 %79  ;;  %v205_v59 = vrot.slane %v104_v21, %v973_v47 }
  0xb1   :  { %v157_v61 = vrot.slane %v80_v22, %v973_v47 }
  0xb2   :  { %v206_v11 = vsel %vm158_vm4, %v205_v59, %v201_v7 }
  0xb3   :  { %v951_v23 = vpop.xlane.xlu1 %238  ;;  %v159_v13 = vsel %vm158_vm4, %v157_v61, %v152_v10 }
  0xb4   :  { %v953_v24 = vpop.xlane.xlu0 %235  ;;  %v305_v38 = vrot.slane %v951_v23, %v965_v41 }
  0xb5   :  { %v301_v39 = vrot.slane %v953_v24, %v971_v46 }
  0xb7   :  { %v955_v25 = vpop.xlane.xlu1 %262 }
  0xb8   :  { %v957_v26 = vpop.xlane.xlu0 %259  ;;  %v344_v34 = vrot.slane %v955_v25, %v965_v41 }
  0xbb   :  { %v107_v27 = vpop.xlane.xlu1 %106 }
  0xbc   :  { %v83_v28 = vpop.xlane.xlu0 %82  ;;  %v210_v62 = vrot.slane %v107_v27, %v975_v48 }
  0xbd   :  { %v164_v2 = vrot.slane %v83_v28, %v975_v48 }
  0xbe   :  { %v211_v14 = vsel %vm165_vm5, %v210_v62, %v206_v11 }
  0xbf   :  { %v959_v30 = vpop.xlane.xlu1 %265  ;;  %v166_v16 = vsel %vm165_vm5, %v164_v2, %v159_v13 }
  0xc0   :  { %v961_v31 = vpop.xlane.xlu0 %241  ;;  %v349_v42 = vrot.slane %v959_v30, %v969_v44 }
  0xc3   :  { %v110_v33 = vpop.xlane.xlu1 %109 }
  0xc4   :  { %v86_v35 = vpop.xlane.xlu0 %85  ;;  %v215_v3 = vrot.slane %v110_v33, %v978_v51 }
  0xc5   :  { %v171_v8 = vrot.slane %v86_v35, %v978_v51  ;;  %v340_v35 = vrot.slane %v957_v26, %v971_v46 }
  0xc6   :  { %v216_v17 = vsel %vm172_vm6, %v215_v3, %v211_v14 }
  0xc7   :  { %v963_v40 = vpop.xlane.xlu1 %268  ;;  %v173_v20 = vsel %vm172_vm6, %v171_v8, %v166_v16  ;;  %v345_v24 = vsel %vm144_vm2, %v344_v34, %v340_v35  ;;  %v468_v8 = vld [vmem:[%s1077_s2] sm:$0xf]  ;;  %s885_s2 = smov [#allocation7]  }
  0xc8   :  { %v967_v43 = vpop.xlane.xlu0 %244  ;;  %v354_v25 = vrot.slane %v963_v40, %v973_v47  ;;  %s708_s15 = sshll.u32 %s885_s2, 4  ;;  %s709_s15 = int_to_ptr.vmem [resolvable:$true] %s708_s15 }
  0xc9   :  { %v315_v26 = vrot.slane %v967_v43, %v973_v47  ;;  %s852_s16 = scalar_lea.vmem %s709_s15, 32  ;;  %p857_p9 = scmp.lt.s32.totalorder %s709_s15, %s709_s15 }
  0xca   :  { %p853_p8 = scmp.ne.s32.totalorder %s709_s15, %s852_s16  ;;  %p858_p10 = scmp.lt.s32.totalorder %s852_s16, %s852_s16 }
  0xcb   :  { %v113_v49 = vpop.xlane.xlu1 %112 }
  0xcc   :  { %v89_v52 = vpop.xlane.xlu0 %88  ;;  %v220_v9 = vrot.slane %v113_v49, %v982_v56  ;;  %v310_v49 = vrot.slane %v961_v31, %v969_v44  ;;  %v306_v31 = vsel %vm144_vm2, %v305_v38, %v301_v39  ;;  %v350_v44 = vsel %vm151_vm3, %v349_v42, %v345_v24  ;;  %p859_p11 = por %p858_p10, %p857_p9 }
  0xcd   :  { %v178_v12 = vrot.slane %v89_v52, %v982_v56  ;;  %v355_v52 = vsel %vm158_vm4, %v354_v25, %v350_v44 }
  0xce   :  { %v221_v21 = vsel %vm179_vm7, %v220_v9, %v216_v17  ;;  %v311_v47 = vsel %vm151_vm3, %v310_v49, %v306_v31  ;;  %p860_p12 = pnand %p859_p11, %p853_p8 }
  0xcf   :  { %v272_v63 = vpop.xlane.xlu1 %271  ;;  %v180_v27 = vsel %vm179_vm7, %v178_v12, %v173_v20  ;;  %v316_v54 = vsel %vm158_vm4, %v315_v26, %v311_v47 }
  0xd0   :  { %v248_v4 = vpop.xlane.xlu0 %247  ;;  %v359_v50 = vrot.slane %v272_v63, %v975_v48 }
  0xd1   :  { %v320_v41 = vrot.slane %v248_v4, %v975_v48 }
  0xd2   :  { %v360_v48 = vsel %vm165_vm5, %v359_v50, %v355_v52 }
  0xd3   :  { %v116_v15 = vpop.xlane.xlu1 %115  ;;  %v321_v57 = vsel %vm165_vm5, %v320_v41, %v316_v54 }
  0xd4   :  { %v225_v18 = vrot.slane %v116_v15, %v993_v5  ;;  %v92_v19 = vpop.xlane.xlu0 %91 }
  0xd5   :  { %v185_v22 = vrot.slane %v92_v19, %v993_v5 }
  0xd6   :  { %v226_v28 = vsel %vm186_vm8, %v225_v18, %v221_v21 }
  0xd7   :  { %v187_v32 = vsel %vm186_vm8, %v185_v22, %v180_v27  ;;  %v275_v33 = vpop.xlane.xlu1 %274 }
  0xd8   :  { %v228_v36 = vsel %vm227_vm9, %v226_v28, %v187_v32  ;;  %v251_v37 = vpop.xlane.xlu0 %250  ;;  %v364_v30 = vrot.slane %v275_v33, %v978_v51 }
  0xd9   :  { %v230_v45 = vadd.f32 %v228_v36, %v68_v29  ;;  %v325_v40 = vrot.slane %v251_v37, %v978_v51 }
  0xda   :  { %v365_v58 = vsel %vm172_vm6, %v364_v30, %v360_v48 }
  0xdb   :  { %232 = vst.msk [vmem:[#allocation2] sm:$0x3] %vm33_vm0, %v230_v45  ;;  %v278_v23 = vpop.xlane.xlu1 %277  ;;  %v326_v60 = vsel %vm172_vm6, %v325_v40, %v321_v57 }
  0xdc   :  { %v254_v46 = vpop.xlane.xlu0 %253  ;;  %v369_v43 = vrot.slane %v278_v23, %v982_v56 }
  0xdd   :  { %v330_v53 = vrot.slane %v254_v46, %v982_v56 }
  0xde   :  { %v370_v61 = vsel %vm179_vm7, %v369_v43, %v365_v58 }
  0xdf   :  { %v281_v55 = vpop.xlane.xlu1 %280  ;;  %v331_v56 = vsel %vm179_vm7, %v330_v53, %v326_v60 }
  0xe0   :  { %v374_v59 = vrot.slane %v281_v55, %v993_v5  ;;  %v257_v51 = vpop.xlane.xlu0 %256 }
  0xe1   :  { %v335_v62 = vrot.slane %v257_v51, %v993_v5 }
  0xe2   :  { %v375_v63 = vsel %vm186_vm8, %v374_v59, %v370_v61  ;;  %v383_v2 = vld [vmem:[#allocation2] sm:$0x3] }
  0xe3   :  { %v336_v3 = vsel %vm186_vm8, %v335_v62, %v331_v56  ;;  %v384_v4 = vmul.f32 0.00390625, %v383_v2 }
  0xe4   :  { %v376_v6 = vsel %vm227_vm9, %v375_v63, %v336_v3 }
  0xe5   :  { %v378_v7 = vmax.f32 %v233_v1, %v376_v6  ;;  %762 = vmatmul.mubr.msk.f32.vlgmr.msra.gmra.mrb[0].mxu0 %vm393_vm10, %v384_v4 }
  0xe6   :  { %790 = vmatprep.mubr.msk.f32.mxu0 %vm884_vm1, %v881_v0  ;;  %789 = vmatpush3.msk.msra.mxu0 %vm548_vm11, %v468_v8 }
  0xe7   :  { %379 = vst.msk [vmem:[#allocation3] sm:$0x3] %vm33_vm0, %v378_v7 }
  0xee   :  { %v469_v5 = vld [vmem:[#allocation3] sm:$0x3] }
  0xef   :  { %781 = vmatmul.mubr.msk.f32.vlgmr.msra.gmra.mrb[0].mxu1 %vm393_vm10, %v469_v5 }
  0xf0   :  { %785 = vmatprep.mubr.msk.f32.mxu1 %vm884_vm1, %v881_v0  ;;  %784 = vmatpush3.msk.msra.mxu1 %vm548_vm11, %v468_v8 }
 0x1b8   :  { %v463_v9 = vpop.f32.mrb[0].mxu0 }
 0x1b9   :  { %v467_v10 = vmax.f32 %v463_v9, 0.0  ;;  %v763_v11 = vpop.f32.mrb[1].mxu0 }
 0x1bb   :  { %791 = vmatmul.mubr.msk.f32.vlgmr.msra.gmra.mrb[2].mxu0 %vm544_vm12, %v467_v10 }
 0x1c2   :  { %v539_v12 = vpop.f32.mrb[0].mxu1 }
 0x1c3   :  { %v543_v13 = vmax.f32 %v539_v12, 0.0  ;;  %v782_v14 = vpop.f32.mrb[1].mxu1 }
 0x1c5   :  { %786 = vmatmul.mubr.msk.f32.vlgmr.msra.gmra.mrb[2].mxu1 %vm544_vm12, %v543_v13 }
 0x28e   :  { %v691_v15 = vpop.f32.mrb[2].mxu0 }
 0x28f   :  { %v792_v16 = vpop.f32.mrb[3].mxu0 }
 0x298   :  { %v618_v17 = vpop.f32.mrb[2].mxu1 }
 0x299   :  { %v692_v0 = vadd.f32 %v691_v15, %v618_v17  ;;  %v787_v18 = vpop.f32.mrb[3].mxu1 }
 0x29b   :  { %v695_v19 = vsub.f32 0.0, %v692_v0 }
 0x29d   :  { %v696_v20 = vmul.f32 1.442695, %v695_v19 }
 0x29f   :  { %826 = vpow2.f32 %v696_v20 }
 0x2a9   :  { %v827_v21 = vpop.eup %826 }
 0x2aa   :  { %v698_v22 = vadd.f32 1.0, %v827_v21 }
 0x2ac   :  { %828 = vrcp.f32 %v698_v22 }
 0x2b6   :  { %v829_v27 = vpop.eup %828 }
 0x2b7   :  { %701 = vst.msk [vmem:[#allocation7] sm:$0x3] %vm33_vm0, %v829_v27 }
 0x2b8   :  { %863 = shalt.err (!%p860_p12)
}
 0x2b9   :  { %s864_s19 = scalar_lea.hbm %s1078_s3, 32 }
 0x2ba   :  { %p865_p13 = scmp.ne.s32.totalorder %s1078_s3, %s864_s19  ;;  %p868_p0 = scmp.lt.u32.totalorder %s864_s19, %s1078_s3 }
 0x2bc   :  { %p870_p1 = pnand %p868_p0, %p865_p13 }
 0x2be   :  { %873 = shalt.err (!%p870_p1)
}
 0x2bf   :  { %711 = dma.vmem_to_hbm [thread:$0]  %s709_s15, 32, %s1078_s3, [#allocation6]  }
 0x2c0   :  { %876 = dma.done.wait [#allocation6], 32  }
 0x2c1   :  { %877 = vsyncadd [#allocation6], 4294967264 }
 0x2c2   :  { %715 = vsyncpa [#allocation5], 1 }
 0x2c3   :  { %716 = vsyncpa [#allocation6], 1 }

</bundles_post_ra>
